<compile_context>
chip_gen: v5e
topology: v5e:2x2
jax: 0.10.0
libtpu: 0.0.40
codegen_flags: <defaults>
</compile_context>

<pallas_src>
import functools

import jax
import jax.numpy as jnp
from jax.experimental import pallas as pl
from jax.experimental.pallas import tpu as pltpu


def _split2d_kernel(x_ref, z1_ref, z2_ref, *, c: int):
    """Channel split for one (batch, spatial-tile) grid step.

    x_ref : (1, C,     tile_s)  VMEM
    z1_ref: (1, c,     tile_s)  VMEM
    z2_ref: (1, C - c, tile_s)  VMEM
    """
    z1_ref[...] = x_ref[:, :c, :]
    z2_ref[...] = x_ref[:, c:, :]


def _pick_spatial_tile(S: int, C: int, itemsize: int, vmem_budget_bytes: int) -> int:
    """Largest legal lane tile (multiple of 128 dividing S, or full S) whose
    double-buffered working set (input block + both output blocks) fits the
    VMEM budget."""
    per_elem = 4 * C * itemsize  # 2x buffering * (in block + out1 + out2) per lane element
    if S % 128 != 0 or per_elem * S <= vmem_budget_bytes:
        # Either the whole row fits, or the (8,128) rule forces full extent.
        return S
    best = None
    t = 128
    while t <= S:
        if S % t == 0 and per_elem * t <= vmem_budget_bytes:
            best = t
        t += 128
    return best if best is not None else 128


def split2d_forward(z: jax.Array, channels_to_keep=None,
                    vmem_budget_bytes: int = 12 * 1024 * 1024):
    """Equivalent of Split2d(channels_to_keep).forward(z) -> ((z1, z2), 0.0).

    vmem_budget_bytes is conservative enough for v5e's 16 MiB scoped-VMEM
    default and v7x's 64 MiB physical VMEM; it can be raised on v6e
    (128 MiB VMEM) for slightly better HBM utilisation.
    """
    B, C, H, W = z.shape
    c = C // 2 if channels_to_keep is None else int(channels_to_keep)
    assert 0 <= c <= C, "channels_to_keep out of range"

    if c == 0 or c == C:
        # TODO(synk): zero-channel half handled outside Pallas (0-sized blocks unsupported).
        return (z[:, :c], z[:, c:]), jnp.asarray(0.0, jnp.float32)

    S = H * W
    itemsize = jnp.dtype(z.dtype).itemsize
    tile_s = _pick_spatial_tile(S, C, itemsize, vmem_budget_bytes)
    n_s = S // tile_s

    # Free view: contiguous NCHW -> (B, C, H*W); channels stay on sublanes,
    # the flattened spatial axis becomes a large, 128-dense lane axis.
    x = z.reshape(B, C, S)

    z1_flat, z2_flat = pl.pallas_call(
        functools.partial(_split2d_kernel, c=c),
        out_shape=(
            jax.ShapeDtypeStruct((B, c, S), z.dtype),
            jax.ShapeDtypeStruct((B, C - c, S), z.dtype),
        ),
        grid=(B, n_s),
        in_specs=[pl.BlockSpec((1, C, tile_s), lambda b, s: (b, 0, s))],
        out_specs=(
            pl.BlockSpec((1, c, tile_s), lambda b, s: (b, 0, s)),
            pl.BlockSpec((1, C - c, tile_s), lambda b, s: (b, 0, s)),
        ),
        compiler_params=pltpu.CompilerParams(
            dimension_semantics=("parallel", "parallel")),
        cost_estimate=pl.CostEstimate(
            flops=0,
            transcendentals=0,
            bytes_accessed=2 * B * C * S * itemsize),
    )(x)

    z1 = z1_flat.reshape(B, c, H, W)
    z2 = z2_flat.reshape(B, C - c, H, W)
    # Split2d is pure slicing => log-det Jacobian is 0 (PyTorch returns 0.0).
    return (z1, z2), jnp.asarray(0.0, jnp.float32)


if __name__ == "__main__":
    key = jax.random.PRNGKey(0)
    B, C, H, W = 2, 4, 16, 16
    z = jax.random.normal(key, (B, C, H, W), dtype=jnp.float32)

    # Default: keep C // 2 channels in the first half.
    (z1, z2), logdet = split2d_forward(z)
    z1 = jax.block_until_ready(z1)
    z2 = jax.block_until_ready(z2)
    assert z1.shape == (B, C // 2, H, W)
    assert z2.shape == (B, C - C // 2, H, W)
    assert jnp.array_equal(z1, z[:, : C // 2]), "z1 mismatch vs reference slice"
    assert jnp.array_equal(z2, z[:, C // 2:]), "z2 mismatch vs reference slice"
    assert float(logdet) == 0.0

    # Explicit channels_to_keep.
    (a1, a2), _ = split2d_forward(z, channels_to_keep=1)
    a1 = jax.block_until_ready(a1)
    a2 = jax.block_until_ready(a2)
    assert jnp.array_equal(a1, z[:, :1]), "a1 mismatch vs reference slice"
    assert jnp.array_equal(a2, z[:, 1:]), "a2 mismatch vs reference slice"

    print("KERNEL_OK")
</pallas_src>

<mosaic_0001>
module attributes {stable_mosaic.version = 11 : i64} {
  func.func @_split2d_kernel(%arg0: i32, %arg1: i32, %arg2: memref<1x4x256xf32, #tpu.memory_space<vmem>>, %arg3: memref<1x2x256xf32, #tpu.memory_space<vmem>>, %arg4: memref<1x2x256xf32, #tpu.memory_space<vmem>>) attributes {dimension_semantics = [#tpu.dimension_semantics<parallel>, #tpu.dimension_semantics<parallel>], iteration_bounds = array<i64: 2, 1>, scalar_prefetch = 0 : i64, scratch_operands = 0 : i64, tpu.core_type = #tpu.core_type<tc>, window_params = [{transform_indices = @transform_0, window_bounds = array<i64: 1, 4, 256>}, {transform_indices = @transform_1, window_bounds = array<i64: 1, 2, 256>}, {transform_indices = @transform_2, window_bounds = array<i64: 1, 2, 256>}]} {
    %c0 = arith.constant 0 : index
    %c0_0 = arith.constant 0 : index
    %c0_1 = arith.constant 0 : index
    %0 = vector.load %arg2[%c0, %c0_0, %c0_1] : memref<1x4x256xf32, #tpu.memory_space<vmem>>, vector<1x2x256xf32>
    %c0_2 = arith.constant 0 : index
    %c0_3 = arith.constant 0 : index
    %c0_4 = arith.constant 0 : index
    %1 = vector.load %arg3[%c0_2, %c0_3, %c0_4] : memref<1x2x256xf32, #tpu.memory_space<vmem>>, vector<1x2x256xf32>
    tpu.vector_store %arg3[%c0_2, %c0_3, %c0_4], %0 {strides = array<i32>} : memref<1x2x256xf32, #tpu.memory_space<vmem>>, vector<1x2x256xf32>,
    %c0_5 = arith.constant 0 : index
    %c2 = arith.constant 2 : index
    %c0_6 = arith.constant 0 : index
    %2 = vector.load %arg2[%c0_5, %c2, %c0_6] : memref<1x4x256xf32, #tpu.memory_space<vmem>>, vector<1x2x256xf32>
    %c0_7 = arith.constant 0 : index
    %c0_8 = arith.constant 0 : index
    %c0_9 = arith.constant 0 : index
    %3 = vector.load %arg4[%c0_7, %c0_8, %c0_9] : memref<1x2x256xf32, #tpu.memory_space<vmem>>, vector<1x2x256xf32>
    tpu.vector_store %arg4[%c0_7, %c0_8, %c0_9], %2 {strides = array<i32>} : memref<1x2x256xf32, #tpu.memory_space<vmem>>, vector<1x2x256xf32>,
    return
  }
  func.func @transform_0(%arg0: i32, %arg1: i32) -> (i32, i32, i32) {
    %c0_i32 = arith.constant 0 : i32
    %c0_i32_0 = arith.constant 0 : i32
    return %arg0, %c0_i32, %arg1 : i32, i32, i32
  }
  func.func @transform_1(%arg0: i32, %arg1: i32) -> (i32, i32, i32) {
    %c0_i32 = arith.constant 0 : i32
    %c0_i32_0 = arith.constant 0 : i32
    return %arg0, %c0_i32, %arg1 : i32, i32, i32
  }
  func.func @transform_2(%arg0: i32, %arg1: i32) -> (i32, i32, i32) {
    %c0_i32 = arith.constant 0 : i32
    %c0_i32_0 = arith.constant 0 : i32
    return %arg0, %c0_i32, %arg1 : i32, i32, i32
  }
}

</mosaic_0001>

<bundles_post_ra>
// kernel: tpu_custom_call.1
= control target key start
LH: loop header
LB: loop body
LE: loop exit
PB: predicated region body
PF: predicated region fallthrough
CT: control target
= control target key end

     0   :  { %8 = vsyncpa [#allocation3], 0  ;;  %s756_s0 = inlined_call_operand.hbm [shape: f32[2,4,256], index: 0, kind: input, shape index: {}]   ;;  %s757_s1 = inlined_call_operand.hbm [shape: f32[2,2,256], index: 1, kind: output, shape index: {0}]   ;;  %s758_s2 = inlined_call_operand.hbm [shape: f32[2,2,256], index: 2, kind: output, shape index: {1}]  }
   0x1   :  { %10 = vsyncpa [#allocation3 + $0x1], 0 }
   0x2   :  { %11 = vsyncpa [#allocation4], 0 }
   0x3   :  { %13 = vsyncpa [#allocation4 + $0x1], 0 }
   0x4   :  { %14 = vsyncpa [#allocation7], 0 }
   0x5   :  { %16 = vsyncpa [#allocation7 + $0x1], 0  ;;  %s621_s9 = smov 0   ;;  %s623_s10 = smov 0  }
   0x6   :  { %s625_s11 = smov 0   ;;  %s627_s12 = smov 0  }
   0x7   :  { %s629_s13 = smov 0   ;;  %s631_s14 = smov 0  }
   0x8 LB: > { %s371_s15 = sadd.s32 4294967295, %s604_s14   ;;  %s372_s16 = sadd.s32 4294967294, %s604_s14   ;;  %s604_s14 = sphi %s631_s14, %s22_s14   ;;  %s600_s13 = sphi %s629_s13, %s767_s13   ;;  %s596_s12 = sphi %s627_s12, %s766_s12   ;;  %s592_s11 = sphi %s625_s11, %s765_s11   ;;  %s588_s10 = sphi %s623_s10, %s764_s10   ;;  %s584_s9 = sphi %s621_s9, %s763_s9  }
   0x9   : > { %s34_s17 = sadd.s32 1, %s600_s13  ;;  %s43_s18 = sadd.s32 1, %s592_s11 }
   0xa   : > { %p36_p0 = scmp.ge.s32.totalorder %s34_s17, 2  ;;  %p50_p1 = scmp.ne.s32.totalorder %s592_s11, %s588_s10 }
   0xb   : > { %p51_p2 = scmp.eq.s32.totalorder %s604_s14, 0  ;;  %p56_p3 = scmp.ne.s32.totalorder %s588_s10, %s584_s9 }
   0xc   : > { %s769_s17 = smov (%p36_p0, %s34_s17), 0  ;;  %p57_p5 = scmp.eq.s32.totalorder %s371_s15, 0 }
   0xd   : > { %p662_p4 = por %p51_p2, %p50_p1  ;;  %s38_s20 = ssub.s32 %s600_s13, %s769_s17 }
   0xe   : > { %p82_p6 = scmp.eq.s32.totalorder %s371_s15, 1  ;;  %p41_p7 = scmp.eq.s32.totalorder %s38_s20, 0 }
   0xf   : > { %p668_p8 = por %p57_p5, %p56_p3  ;;  %p88_p10 = scmp.eq.s32.totalorder %s372_s16, 1 }
  0x10   : > { %p672_p9 = por %p82_p6, %p50_p1  ;;  %p374_p12 = scmp.ge.s32.totalorder %s604_s14, 2 }
  0x11   : > { %s677_s23 = scalar_select %p41_p7, %s592_s11, %s43_s18  }
  0x12   : > { %p679_p11 = por %p88_p10, %p56_p3  ;;  %p410_p13 = scmp.lt.s32.totalorder %s604_s14, 2 }
  0x13   : > { %s136_s25 = sand.u32 1, %s592_s11   ;;  %s390_s27 = sshll.u32 %s600_s13, 3 }
  0x14   : > { %s375_s26 = sshll.u32 %s136_s25, 3  ;;  %s147_s30 = scalar_lea.hbm %s756_s0, %s390_s27 }
  0x15   : > { %s140_s3 = scalar_lea.vmem [#allocation2], %s375_s26  ;;  %s149_s5 = sshll.u32 %s147_s30, 4  ;;  %s150_s5 = int_to_ptr.hbm [resolvable:$true] %s149_s5 }
  0x16   : > { %s151_s4 = sshll.u32 %s140_s3, 4  ;;  %p400_p0 = pnand %p410_p13, %p662_p4  ;;  %s152_s4 = int_to_ptr.vmem [resolvable:$true] %s151_s4 }
  0x17   : > { %p378_p1 = scmp.ge.s32.totalorder %s604_s14, 1  ;;  %p156_p2 = scmp.lt.s32.totalorder %s604_s14, 3 }
  0x18   : > { %s137_s6 = scalar_lea.sflag [#allocation3], %s136_s25 }
  0x19   : > { %402 = dma.hbm_to_vmem [thread:$0]  (!%p400_p0), %s150_s5, 128, %s152_s4, %s137_s6  }
  0x1a   : > { %p157_p3 = pnand %p378_p1, %p156_p2 }
  0x1b   : > { %s695_s7 = sand.u32 (!%p157_p3), 1, %s588_s10  }
  0x1c   : > { %160 = sbr.rel (%p157_p3) target bundleno = 63 (0x3f), region = 24  ;;  %s379_s8 = sshll.u32 (!%p157_p3), %s695_s7, 3 }
  0x1d   : > { %s163_s15 = scalar_lea.sflag (!%p157_p3), [#allocation3], %s695_s7  ;;  %s166_s16 = scalar_lea.vmem (!%p157_p3), [#allocation2], %s379_s8 }
  0x21   : > { %571 = dma.done.wait (%p668_p8), %s163_s15, 128  }
  0x22   : > { %573 = vsyncadd (%p668_p8), %s163_s15, 4294967168  ;;  %s380_s18 = sshll.u32 %s695_s7, 2  ;;  %s391_s19 = sshll.u32 %s596_s12, 2  ;;  %v203_v0 = vld [vmem:[%s166_s16] sm:$0xcc]  ;;  %vm199_vm0 = vcmask 1041408  }
  0x23   : > { %s229_s26 = scalar_lea.hbm %s757_s1, %s391_s19  ;;  %s185_s27 = scalar_lea.vmem [#allocation5], %s380_s18  ;;  %v196_v1 = vld [vmem:[%s166_s16] sm:$0x33]  ;;  %205 = vst.sshfl [vmem:[#allocation1] sm:$0xff pattern:$0x75643120] %v203_v0 }
  0x24   : > { %s231_s28 = sshll.u32 %s185_s27, 4  ;;  %s233_s29 = sshll.u32 %s229_s26, 4  ;;  %v198_v2 = vrot.slane %v196_v1, 2  ;;  %s232_s28 = int_to_ptr.vmem [resolvable:$true] %s231_s28  ;;  %s234_s29 = int_to_ptr.hbm [resolvable:$true] %s233_s29 }
  0x25   : > { %s246_s3 = scalar_lea.hbm %s758_s2, %s391_s19  ;;  %s192_s12 = scalar_lea.vmem [#allocation6], %s380_s18 }
  0x26   : > { %v200_v3 = vsel %vm199_vm0, %v196_v1, %v198_v2  ;;  %s248_s4 = sshll.u32 %s192_s12, 4  ;;  %s250_s5 = sshll.u32 %s246_s3, 4  ;;  %s249_s4 = int_to_ptr.vmem [resolvable:$true] %s248_s4  ;;  %s251_s5 = int_to_ptr.hbm [resolvable:$true] %s250_s5 }
  0x27   : > { %202 = vst [vmem:[%s185_s27] sm:$0xf] %v200_v3  ;;  %s211_s6 = scalar_lea.sflag [#allocation4], %s695_s7  ;;  %s504_s8 = sshra.s32 %s234_s29, 4  ;;  %s505_s8 = int_to_ptr.hbm [resolvable:$true] %s504_s8 }
  0x28   : > { %s506_s15 = scalar_lea.hbm %s505_s8, 4  ;;  %s510_s25 = scalar_lea.hbm %s757_s1, 8 }
  0x29   : > { %p507_p4 = scmp.ne.s32.totalorder %s505_s8, %s506_s15  ;;  %p511_p7 = scmp.lt.s32.totalorder %s505_s8, %s757_s1 }
  0x2a   : > { %p512_p8 = scmp.lt.s32.totalorder %s510_s25, %s506_s15 }
  0x2b   : > { %p508_p5 = pnand %p507_p4, %p672_p9 }
  0x2c   : > { %p513_p10 = por %p512_p8, %p511_p7 }
  0x2d   : > { %p509_p6 = pneg %p508_p5 }
  0x2f   : > { %p514_p13 = pnand %p513_p10, %p509_p6 }
  0x31   : > { %517 = shalt.err (!%p514_p13)
}
  0x32   : > { %395 = dma.vmem_to_hbm [thread:$0]  (%p672_p9), %s232_s28, 64, %s234_s29, %s211_s6   ;;  %v207_v4 = vld [vmem:[#allocation1 + $0x1] ss:$2 sm:$0xff] }
  0x33   : > { %209 = vst [vmem:[%s192_s12] sm:$0xf] %v207_v4  ;;  %s216_s18 = scalar_lea.sflag [#allocation7], %s695_s7  ;;  %s532_s27 = sshra.s32 %s251_s5, 4  ;;  %s533_s27 = int_to_ptr.hbm [resolvable:$true] %s532_s27 }
  0x34   : > { %s534_s21 = scalar_lea.hbm %s533_s27, 4  ;;  %s538_s8 = scalar_lea.hbm %s758_s2, 8 }
  0x35   : > { %p535_p0 = scmp.ne.s32.totalorder %s533_s27, %s534_s21  ;;  %p539_p3 = scmp.lt.s32.totalorder %s533_s27, %s758_s2 }
  0x36   : > { %p540_p4 = scmp.lt.s32.totalorder %s538_s8, %s534_s21 }
  0x37   : > { %p536_p1 = pnand %p535_p0, %p672_p9 }
  0x38   : > { %p541_p5 = por %p540_p4, %p539_p3 }
  0x39   : > { %p537_p2 = pneg %p536_p1 }
  0x3b   : > { %p542_p6 = pnand %p541_p5, %p537_p2 }
  0x3d   : > { %545 = shalt.err (!%p542_p6)
}
  0x3e   : > { %396 = dma.vmem_to_hbm [thread:$0]  (%p672_p9), %s249_s4, 64, %s251_s5, %s216_s18  }
  0x3f PF: > { %s262_s7 = sand.u32 1, %s584_s9   ;;  %p404_p7 = pnand %p374_p12, %p679_p11 }
  0x40   : > { %s263_s28 = scalar_lea.sflag [#allocation4], %s262_s7 }
  0x41   : > { %p405_p8 = pneg %p404_p7 }
  0x43   : > { %575 = dma.done.wait (%p405_p8), %s263_s28, 64  }
  0x44   : > { %577 = vsyncadd (%p405_p8), %s263_s28, 4294967232  ;;  %s273_s29 = scalar_lea.sflag [#allocation7], %s262_s7 }
  0x45   : > { %579 = dma.done.wait (%p405_p8), %s273_s29, 64  }
  0x46   : > { %581 = vsyncadd (%p405_p8), %s273_s29, 4294967232  ;;  %s22_s14 = sadd.s32 1, %s604_s14   ;;  %s763_s9 = smov %s588_s10 }
  0x47   : > { %p19_p10 = scmp.ge.s32.totalorder %s22_s14, 4   ;;  %s764_s10 = smov %s592_s11 }
  0x48   : > { %s765_s11 = smov %s677_s23  ;;  %s766_s12 = smov %s600_s13 }
  0x49   : > { %s767_s13 = smov %s769_s17  ;;  %21 = sbr.rel (!%p19_p10) target bundleno = 8 (0x8), region = 87 }
  0x4e   :  { %279 = vsyncpa [#allocation3], 1 }
  0x4f   :  { %281 = vsyncpa [#allocation3 + $0x1], 1 }
  0x50   :  { %282 = vsyncpa [#allocation4], 1 }
  0x51   :  { %284 = vsyncpa [#allocation4 + $0x1], 1 }
  0x52   :  { %285 = vsyncpa [#allocation7], 1 }
  0x53   :  { %287 = vsyncpa [#allocation7 + $0x1], 1 }

</bundles_post_ra>
